<compile_context>
chip_gen: v7x
topology: tpu7x:2x2x1
jax: 0.10.0
libtpu: 0.0.40
codegen_flags: <defaults>
</compile_context>

<pallas_src>
import functools

import jax
import jax.numpy as jnp
from jax.experimental import pallas as pl
from jax.experimental.pallas import tpu as pltpu


def _round_up(x, m):
    return ((x + m - 1) // m) * m


def _choose_row_tile(n, max_tile=512):
    """Largest row tile <= max_tile that divides n (multiples of 8 preferred)."""
    if n <= max_tile:
        return n
    for t in range(max_tile, 7, -8):
        if n % t == 0:
            return t
    return n


# ---------------------------------------------------------------------------
# Single fused kernel: co-attention (both directions) + softmax + top-K mask +
# masked GAT + ReLU + concat + final fc.
# ---------------------------------------------------------------------------
def _crossmodal_fused_kernel(ha_ref, ht_ref, w_all_ref, head_sum_ref, expand_ref,
                             b1_ref, b2_ref, wfc_ref, bfc_ref, out_ref,
                             *, num_heads, hidden_feats, k_top):
    tn = ha_ref.shape[0]
    hd = num_heads * hidden_feats

    # One lane-dense MXU issue: [h_audio ; h_text] @ [Wq | Wk | Wg1 | Wg2].
    x = jnp.concatenate([ha_ref[...], ht_ref[...]], axis=0)                    # (2TN, F) bf16
    proj = jnp.dot(x, w_all_ref[...], preferred_element_type=jnp.float32)      # (2TN, 4HD) f32

    q = proj[:, 0 * hd:1 * hd]                                                 # Q (both modalities)
    k = proj[:, 1 * hd:2 * hd]                                                 # K (both modalities)
    q_a, q_t = q[:tn], q[tn:]
    k_a, k_t = k[:tn], k[tn:]

    # CoAttention for both directions stacked on the sublane axis: [a2t ; t2a].
    # score[n, h] = sum_d q[n, h, d] * k[n, h, d] via a block-diagonal head-sum
    # matrix (MXU-friendly, avoids a lane-crossing reshape/reduce).
    prod = jnp.concatenate([q_a * k_t, q_t * k_a], axis=0)                     # (2TN, HD)
    scores = jnp.dot(prod, head_sum_ref[...],
                     preferred_element_type=jnp.float32)                       # (2TN, H)
    m = jnp.max(scores, axis=-1, keepdims=True)
    e = jnp.exp(scores - m)
    attn = e * pl.reciprocal(jnp.sum(e, axis=-1, keepdims=True), approx=True)  # softmax over heads

    # Top-K head mask:  attn >= (K-th largest)  <=>  (#strictly greater) < K.
    # Identical tie behaviour to torch's `attn >= topk(attn, K).values.min(dim=1)`.
    gt_count = jnp.zeros_like(attn)
    for h in range(num_heads):                       # tiny static unroll over H heads (VPU only)
        gt_count = gt_count + (attn[:, h:h + 1] > attn).astype(jnp.float32)
    mask = (gt_count < float(k_top)).astype(jnp.float32)                       # (2TN, H)

    # Broadcast per-head mask to per-feature: one shared MXU issue for BOTH directions.
    m_exp = jnp.dot(mask, expand_ref[...], preferred_element_type=jnp.float32)  # (2TN, HD)

    # GATConv on the identity-paired in-degree-1 graph: edge_softmax == 1, so the
    # post-softmax attention is exactly the top-K edge-weight mask; bias is added
    # after aggregation (masked-off heads therefore give relu(bias), as in DGL).
    z1 = proj[:tn, 2 * hd:3 * hd]                    # h_audio @ Wg1  (audio -> text)
    z2 = proj[tn:, 3 * hd:4 * hd]                    # h_text  @ Wg2  (text -> audio)
    g1 = jnp.maximum(z1 * m_exp[:tn] + b1_ref[...], 0.0)
    g2 = jnp.maximum(z2 * m_exp[tn:] + b2_ref[...], 0.0)

    # fc(concat([g1, g2], -1)): single K = 2*HD contraction; 128-lane padded output
    # slab so the final store is an unmasked vst.
    g = jnp.concatenate([g1, g2], axis=-1).astype(wfc_ref.dtype)               # (TN, 2HD) bf16
    out = jnp.dot(g, wfc_ref[...], preferred_element_type=jnp.float32)
    out_ref[...] = out + bfc_ref[...]


# ---------------------------------------------------------------------------
# Module wrapper
# ---------------------------------------------------------------------------
class CrossmodalNetPallas:
    def __init__(self, in_feats, hidden_feats, out_feats, num_heads, k_top, key):
        self.H, self.D, self.K = num_heads, hidden_feats, k_top
        self.in_feats, self.out_feats = in_feats, out_feats
        hd = num_heads * hidden_feats
        self.hd = hd
        self.out_pad = _round_up(max(out_feats, 128), 128)   # lane-dense output slab

        ks = jax.random.split(key, 8)
        s = 0.1
        wq = jax.random.normal(ks[0], (in_feats, hd)) * s      # CoAttention query (shared)
        wk = jax.random.normal(ks[1], (in_feats, hd)) * s      # CoAttention key (shared)
        wg1 = jax.random.normal(ks[2], (in_feats, hd)) * s     # GATConv fc, audio->text
        wg2 = jax.random.normal(ks[3], (in_feats, hd)) * s     # GATConv fc, text->audio
        # Stacked projection weights -> a single (F, 4*hd) bf16 MXU matmul in-kernel.
        self.w_all = jnp.concatenate([wq, wk, wg1, wg2], axis=1).astype(jnp.bfloat16)

        self.b1 = (jax.random.normal(ks[4], (1, hd)) * s).astype(jnp.float32)
        self.b2 = (jax.random.normal(ks[5], (1, hd)) * s).astype(jnp.float32)

        # Final fc: Linear(hidden*heads*2, out_feats); zero-padded to >=128 lanes.
        wfc = (jax.random.normal(ks[6], (2 * hd, out_feats)) * s).astype(jnp.float32)
        bfc = (jax.random.normal(ks[7], (1, out_feats)) * s).astype(jnp.float32)
        self.wfc = (jnp.zeros((2 * hd, self.out_pad), jnp.float32)
                    .at[:, :out_feats].set(wfc).astype(jnp.bfloat16))
        self.bfc = jnp.zeros((1, self.out_pad), jnp.float32).at[:, :out_feats].set(bfc)

        # Constant 0/1 helpers: per-head reduce (HD, H) and per-head broadcast (H, HD).
        self.head_sum = jnp.kron(jnp.eye(num_heads),
                                 jnp.ones((hidden_feats, 1))).astype(jnp.float32)
        self.expand = jnp.kron(jnp.eye(num_heads),
                               jnp.ones((1, hidden_feats))).astype(jnp.float32)

    def __call__(self, h_audio, h_text):
        n, f = h_audio.shape
        assert h_text.shape == (n, f)
        tile = _choose_row_tile(n)
        grid = (n // tile,)
        hd, out_pad = self.hd, self.out_pad

        full = lambda arr: pl.BlockSpec(arr.shape, lambda i: (0, 0))
        kernel = functools.partial(_crossmodal_fused_kernel,
                                   num_heads=self.H, hidden_feats=self.D, k_top=self.K)

        flops = (2 * (2 * n) * f * (4 * hd)        # stacked projection
                 + 2 * (2 * n) * hd * self.H       # per-head score reduce
                 + 2 * (2 * n) * self.H * hd       # mask expand
                 + 2 * n * (2 * hd) * out_pad)     # final fc
        bytes_accessed = (2 * n * f * 2 + self.w_all.size * 2 + self.wfc.size * 2
                          + (self.head_sum.size + self.expand.size
                             + self.b1.size + self.b2.size + self.bfc.size) * 4
                          + n * out_pad * 4)

        out = pl.pallas_call(
            kernel,
            out_shape=jax.ShapeDtypeStruct((n, out_pad), jnp.float32),
            grid_spec=pltpu.PrefetchScalarGridSpec(
                num_scalar_prefetch=0,
                grid=grid,
                in_specs=[
                    pl.BlockSpec((tile, f), lambda i: (i, 0)),    # h_audio rows
                    pl.BlockSpec((tile, f), lambda i: (i, 0)),    # h_text rows
                    full(self.w_all), full(self.head_sum), full(self.expand),
                    full(self.b1), full(self.b2), full(self.wfc), full(self.bfc),
                ],
                out_specs=pl.BlockSpec((tile, out_pad), lambda i: (i, 0)),
            ),
            compiler_params=pltpu.CompilerParams(
                dimension_semantics=("parallel",),   # shards row tiles across v7x's 2 TCs
                vmem_limit_bytes=32 * 1024 * 1024,   # fits v7x's smaller scoped VMEM
            ),
            cost_estimate=pl.CostEstimate(
                flops=flops,
                transcendentals=2 * n * self.H,
                bytes_accessed=bytes_accessed),
        )(h_audio.astype(jnp.bfloat16), h_text.astype(jnp.bfloat16),
          self.w_all, self.head_sum, self.expand,
          self.b1, self.b2, self.wfc, self.bfc)
        return out[:, :self.out_feats]


if __name__ == "__main__":
    key = jax.random.PRNGKey(0)
    k_in, k_a, k_t = jax.random.split(key, 3)

    N = 8            # nodes / batch per modality
    IN_FEATS = 32    # inchannels
    HIDDEN = 16      # args.hidden_size
    HEADS = 4        # args.crossmodal_nheads
    K_TOP = 2        # args.K
    OUT = HIDDEN     # HeGraphModel(out_feats == hidden_size)

    model = CrossmodalNetPallas(IN_FEATS, HIDDEN, OUT, HEADS, K_TOP, k_in)

    h_audio = jax.random.normal(k_a, (N, IN_FEATS), jnp.float32)
    h_text = jax.random.normal(k_t, (N, IN_FEATS), jnp.float32)

    out = model(h_audio, h_text)
    jax.block_until_ready(out)
    assert out.shape == (N, OUT), out.shape
    assert bool(jnp.all(jnp.isfinite(out)))
    print("KERNEL_OK")
</pallas_src>

<mosaic_0001>
module attributes {stable_mosaic.version = 11 : i64} {
  func.func @_crossmodal_fused_kernel(%arg0: i32, %arg1: memref<8x32xbf16, #tpu.memory_space<vmem>>, %arg2: memref<8x32xbf16, #tpu.memory_space<vmem>>, %arg3: memref<32x256xbf16, #tpu.memory_space<vmem>>, %arg4: memref<64x4xf32, #tpu.memory_space<vmem>>, %arg5: memref<4x64xf32, #tpu.memory_space<vmem>>, %arg6: memref<1x64xf32, #tpu.memory_space<vmem>>, %arg7: memref<1x64xf32, #tpu.memory_space<vmem>>, %arg8: memref<128x128xbf16, #tpu.memory_space<vmem>>, %arg9: memref<1x128xf32, #tpu.memory_space<vmem>>, %arg10: memref<8x128xf32, #tpu.memory_space<vmem>>) attributes {dimension_semantics = [#tpu.dimension_semantics<parallel>], iteration_bounds = array<i64: 1>, scalar_prefetch = 0 : i64, scratch_operands = 0 : i64, tpu.core_type = #tpu.core_type<tc>, window_params = [{transform_indices = @transform_0, window_bounds = array<i64: 8, 32>}, {transform_indices = @transform_1, window_bounds = array<i64: 8, 32>}, {pipeline_mode = #tpu.pipeline_mode<synchronous>, transform_indices = @transform_2, window_bounds = array<i64: 32, 256>}, {pipeline_mode = #tpu.pipeline_mode<synchronous>, transform_indices = @transform_3, window_bounds = array<i64: 64, 4>}, {pipeline_mode = #tpu.pipeline_mode<synchronous>, transform_indices = @transform_4, window_bounds = array<i64: 4, 64>}, {pipeline_mode = #tpu.pipeline_mode<synchronous>, transform_indices = @transform_5, window_bounds = array<i64: 1, 64>}, {pipeline_mode = #tpu.pipeline_mode<synchronous>, transform_indices = @transform_6, window_bounds = array<i64: 1, 64>}, {pipeline_mode = #tpu.pipeline_mode<synchronous>, transform_indices = @transform_7, window_bounds = array<i64: 128, 128>}, {pipeline_mode = #tpu.pipeline_mode<synchronous>, transform_indices = @transform_8, window_bounds = array<i64: 1, 128>}, {transform_indices = @transform_9, window_bounds = array<i64: 8, 128>}]} {
    %c0 = arith.constant 0 : index
    %c0_0 = arith.constant 0 : index
    %0 = vector.load %arg1[%c0, %c0_0] : memref<8x32xbf16, #tpu.memory_space<vmem>>, vector<8x32xbf16>
    %c0_1 = arith.constant 0 : index
    %c0_2 = arith.constant 0 : index
    %1 = vector.load %arg2[%c0_1, %c0_2] : memref<8x32xbf16, #tpu.memory_space<vmem>>, vector<8x32xbf16>
    %2 = tpu.concatenate %0, %1 in 0 : vector<8x32xbf16>, vector<8x32xbf16> -> vector<16x32xbf16>
    %c0_3 = arith.constant 0 : index
    %c0_4 = arith.constant 0 : index
    %3 = vector.load %arg3[%c0_3, %c0_4] : memref<32x256xbf16, #tpu.memory_space<vmem>>, vector<32x256xbf16>
    %cst = arith.constant dense<0.000000e+00> : vector<16x256xf32>
    %4 = tpu.matmul %2, %3, %cst {dimension_numbers = #tpu.dot_dimension_numbers<[1], [0], [0], [1], [0, 0, 1, 1], [], []>} : vector<16x32xbf16>, vector<32x256xbf16>, vector<16x256xf32> -> vector<16x256xf32>
    %5 = vector.extract_strided_slice %4 {offsets = [0, 0], sizes = [16, 64], strides = [1, 1]} : vector<16x256xf32> to vector<16x64xf32>
    %6 = vector.extract_strided_slice %4 {offsets = [0, 64], sizes = [16, 64], strides = [1, 1]} : vector<16x256xf32> to vector<16x64xf32>
    %7 = vector.extract_strided_slice %5 {offsets = [0, 0], sizes = [8, 64], strides = [1, 1]} : vector<16x64xf32> to vector<8x64xf32>
    %8 = vector.extract_strided_slice %5 {offsets = [8, 0], sizes = [8, 64], strides = [1, 1]} : vector<16x64xf32> to vector<8x64xf32>
    %9 = vector.extract_strided_slice %6 {offsets = [0, 0], sizes = [8, 64], strides = [1, 1]} : vector<16x64xf32> to vector<8x64xf32>
    %10 = vector.extract_strided_slice %6 {offsets = [8, 0], sizes = [8, 64], strides = [1, 1]} : vector<16x64xf32> to vector<8x64xf32>
    %11 = arith.mulf %7, %10 : vector<8x64xf32>
    %12 = arith.mulf %8, %9 : vector<8x64xf32>
    %13 = tpu.concatenate %11, %12 in 0 : vector<8x64xf32>, vector<8x64xf32> -> vector<16x64xf32>
    %c0_5 = arith.constant 0 : index
    %c0_6 = arith.constant 0 : index
    %14 = vector.load %arg4[%c0_5, %c0_6] : memref<64x4xf32, #tpu.memory_space<vmem>>, vector<64x4xf32>
    %cst_7 = arith.constant dense<0.000000e+00> : vector<16x4xf32>
    %15 = tpu.matmul %13, %14, %cst_7 {dimension_numbers = #tpu.dot_dimension_numbers<[1], [0], [0], [1], [0, 0, 1, 1], [], []>} : vector<16x64xf32>, vector<64x4xf32>, vector<16x4xf32> -> vector<16x4xf32>
    %cst_8 = arith.constant dense<0xFF800000> : vector<16xf32>
    %16 = vector.multi_reduction <maximumf>, %15, %cst_8 [1] : vector<16x4xf32> to vector<16xf32>
    %17 = vector.shape_cast %16 : vector<16xf32> to vector<16x1xf32>
    %18 = vector.broadcast %17 : vector<16x1xf32> to vector<16x4xf32>
    %19 = arith.subf %15, %18 : vector<16x4xf32>
    %20 = math.exp %19 : vector<16x4xf32>
    %cst_9 = arith.constant dense<0.000000e+00> : vector<16xf32>
    %21 = vector.multi_reduction <add>, %20, %cst_9 [1] : vector<16x4xf32> to vector<16xf32>
    %22 = vector.shape_cast %21 : vector<16xf32> to vector<16x1xf32>
    %23 = tpu.reciprocal %22 {approx = true} : vector<16x1xf32> -> vector<16x1xf32>
    %24 = vector.broadcast %23 : vector<16x1xf32> to vector<16x4xf32>
    %25 = arith.mulf %20, %24 : vector<16x4xf32>
    %cst_10 = arith.constant 0.000000e+00 : f32
    %26 = vector.broadcast %cst_10 : f32 to vector<16x4xf32>
    %27 = vector.extract_strided_slice %25 {offsets = [0, 0], sizes = [16, 1], strides = [1, 1]} : vector<16x4xf32> to vector<16x1xf32>
    %28 = vector.broadcast %27 : vector<16x1xf32> to vector<16x4xf32>
    %29 = arith.cmpf ogt, %28, %25 : vector<16x4xf32>
    %30 = arith.extui %29 : vector<16x4xi1> to vector<16x4xi32>
    %31 = arith.sitofp %30 : vector<16x4xi32> to vector<16x4xf32>
    %32 = arith.addf %26, %31 : vector<16x4xf32>
    %33 = vector.extract_strided_slice %25 {offsets = [0, 1], sizes = [16, 1], strides = [1, 1]} : vector<16x4xf32> to vector<16x1xf32>
    %34 = vector.broadcast %33 : vector<16x1xf32> to vector<16x4xf32>
    %35 = arith.cmpf ogt, %34, %25 : vector<16x4xf32>
    %36 = arith.extui %35 : vector<16x4xi1> to vector<16x4xi32>
    %37 = arith.sitofp %36 : vector<16x4xi32> to vector<16x4xf32>
    %38 = arith.addf %32, %37 : vector<16x4xf32>
    %39 = vector.extract_strided_slice %25 {offsets = [0, 2], sizes = [16, 1], strides = [1, 1]} : vector<16x4xf32> to vector<16x1xf32>
    %40 = vector.broadcast %39 : vector<16x1xf32> to vector<16x4xf32>
    %41 = arith.cmpf ogt, %40, %25 : vector<16x4xf32>
    %42 = arith.extui %41 : vector<16x4xi1> to vector<16x4xi32>
    %43 = arith.sitofp %42 : vector<16x4xi32> to vector<16x4xf32>
    %44 = arith.addf %38, %43 : vector<16x4xf32>
    %45 = vector.extract_strided_slice %25 {offsets = [0, 3], sizes = [16, 1], strides = [1, 1]} : vector<16x4xf32> to vector<16x1xf32>
    %46 = vector.broadcast %45 : vector<16x1xf32> to vector<16x4xf32>
    %47 = arith.cmpf ogt, %46, %25 : vector<16x4xf32>
    %48 = arith.extui %47 : vector<16x4xi1> to vector<16x4xi32>
    %49 = arith.sitofp %48 : vector<16x4xi32> to vector<16x4xf32>
    %50 = arith.addf %44, %49 : vector<16x4xf32>
    %cst_11 = arith.constant 2.000000e+00 : f32
    %51 = vector.broadcast %cst_11 : f32 to vector<16x4xf32>
    %52 = arith.cmpf olt, %50, %51 : vector<16x4xf32>
    %53 = arith.extui %52 : vector<16x4xi1> to vector<16x4xi32>
    %54 = arith.sitofp %53 : vector<16x4xi32> to vector<16x4xf32>
    %c0_12 = arith.constant 0 : index
    %c0_13 = arith.constant 0 : index
    %55 = vector.load %arg5[%c0_12, %c0_13] : memref<4x64xf32, #tpu.memory_space<vmem>>, vector<4x64xf32>
    %cst_14 = arith.constant dense<0.000000e+00> : vector<16x64xf32>
    %56 = tpu.matmul %54, %55, %cst_14 {dimension_numbers = #tpu.dot_dimension_numbers<[1], [0], [0], [1], [0, 0, 1, 1], [], []>} : vector<16x4xf32>, vector<4x64xf32>, vector<16x64xf32> -> vector<16x64xf32>
    %57 = vector.extract_strided_slice %4 {offsets = [0, 128], sizes = [8, 64], strides = [1, 1]} : vector<16x256xf32> to vector<8x64xf32>
    %58 = vector.extract_strided_slice %4 {offsets = [8, 192], sizes = [8, 64], strides = [1, 1]} : vector<16x256xf32> to vector<8x64xf32>
    %59 = vector.extract_strided_slice %56 {offsets = [0, 0], sizes = [8, 64], strides = [1, 1]} : vector<16x64xf32> to vector<8x64xf32>
    %60 = arith.mulf %57, %59 : vector<8x64xf32>
    %c0_15 = arith.constant 0 : index
    %c0_16 = arith.constant 0 : index
    %61 = vector.load %arg6[%c0_15, %c0_16] : memref<1x64xf32, #tpu.memory_space<vmem>>, vector<1x64xf32>
    %62 = vector.broadcast %61 : vector<1x64xf32> to vector<8x64xf32>
    %63 = arith.addf %60, %62 : vector<8x64xf32>
    %cst_17 = arith.constant 0.000000e+00 : f32
    %64 = vector.broadcast %cst_17 : f32 to vector<8x64xf32>
    %65 = arith.maximumf %63, %64 : vector<8x64xf32>
    %66 = vector.extract_strided_slice %56 {offsets = [8, 0], sizes = [8, 64], strides = [1, 1]} : vector<16x64xf32> to vector<8x64xf32>
    %67 = arith.mulf %58, %66 : vector<8x64xf32>
    %c0_18 = arith.constant 0 : index
    %c0_19 = arith.constant 0 : index
    %68 = vector.load %arg7[%c0_18, %c0_19] : memref<1x64xf32, #tpu.memory_space<vmem>>, vector<1x64xf32>
    %69 = vector.broadcast %68 : vector<1x64xf32> to vector<8x64xf32>
    %70 = arith.addf %67, %69 : vector<8x64xf32>
    %cst_20 = arith.constant 0.000000e+00 : f32
    %71 = vector.broadcast %cst_20 : f32 to vector<8x64xf32>
    %72 = arith.maximumf %70, %71 : vector<8x64xf32>
    %73 = tpu.concatenate %65, %72 in 1 : vector<8x64xf32>, vector<8x64xf32> -> vector<8x128xf32>
    %74 = arith.truncf %73 : vector<8x128xf32> to vector<8x128xbf16>
    %c0_21 = arith.constant 0 : index
    %c0_22 = arith.constant 0 : index
    %75 = vector.load %arg8[%c0_21, %c0_22] : memref<128x128xbf16, #tpu.memory_space<vmem>>, vector<128x128xbf16>
    %cst_23 = arith.constant dense<0.000000e+00> : vector<8x128xf32>
    %76 = tpu.matmul %74, %75, %cst_23 {dimension_numbers = #tpu.dot_dimension_numbers<[1], [0], [0], [1], [0, 0, 1, 1], [], []>} : vector<8x128xbf16>, vector<128x128xbf16>, vector<8x128xf32> -> vector<8x128xf32>
    %c0_24 = arith.constant 0 : index
    %c0_25 = arith.constant 0 : index
    %77 = vector.load %arg9[%c0_24, %c0_25] : memref<1x128xf32, #tpu.memory_space<vmem>>, vector<1x128xf32>
    %78 = vector.broadcast %77 : vector<1x128xf32> to vector<8x128xf32>
    %79 = arith.addf %76, %78 : vector<8x128xf32>
    %c0_26 = arith.constant 0 : index
    %c0_27 = arith.constant 0 : index
    %80 = vector.load %arg10[%c0_26, %c0_27] : memref<8x128xf32, #tpu.memory_space<vmem>>, vector<8x128xf32>
    tpu.vector_store %arg10[%c0_26, %c0_27], %79 {strides = array<i32>} : memref<8x128xf32, #tpu.memory_space<vmem>>, vector<8x128xf32>,
    return
  }
  func.func @transform_0(%arg0: i32) -> (i32, i32) {
    %c0_i32 = arith.constant 0 : i32
    %c0_i32_0 = arith.constant 0 : i32
    return %arg0, %c0_i32 : i32, i32
  }
  func.func @transform_1(%arg0: i32) -> (i32, i32) {
    %c0_i32 = arith.constant 0 : i32
    %c0_i32_0 = arith.constant 0 : i32
    return %arg0, %c0_i32 : i32, i32
  }
  func.func @transform_2(%arg0: i32) -> (i32, i32) {
    %c0_i32 = arith.constant 0 : i32
    %c0_i32_0 = arith.constant 0 : i32
    %c0_i32_1 = arith.constant 0 : i32
    return %c0_i32, %c0_i32_0 : i32, i32
  }
  func.func @transform_3(%arg0: i32) -> (i32, i32) {
    %c0_i32 = arith.constant 0 : i32
    %c0_i32_0 = arith.constant 0 : i32
    %c0_i32_1 = arith.constant 0 : i32
    return %c0_i32, %c0_i32_0 : i32, i32
  }
  func.func @transform_4(%arg0: i32) -> (i32, i32) {
    %c0_i32 = arith.constant 0 : i32
    %c0_i32_0 = arith.constant 0 : i32
    %c0_i32_1 = arith.constant 0 : i32
    return %c0_i32, %c0_i32_0 : i32, i32
  }
  func.func @transform_5(%arg0: i32) -> (i32, i32) {
    %c0_i32 = arith.constant 0 : i32
    %c0_i32_0 = arith.constant 0 : i32
    %c0_i32_1 = arith.constant 0 : i32
    return %c0_i32, %c0_i32_0 : i32, i32
  }
  func.func @transform_6(%arg0: i32) -> (i32, i32) {
    %c0_i32 = arith.constant 0 : i32
    %c0_i32_0 = arith.constant 0 : i32
    %c0_i32_1 = arith.constant 0 : i32
    return %c0_i32, %c0_i32_0 : i32, i32
  }
  func.func @transform_7(%arg0: i32) -> (i32, i32) {
    %c0_i32 = arith.constant 0 : i32
    %c0_i32_0 = arith.constant 0 : i32
    %c0_i32_1 = arith.constant 0 : i32
    return %c0_i32, %c0_i32_0 : i32, i32
  }
  func.func @transform_8(%arg0: i32) -> (i32, i32) {
    %c0_i32 = arith.constant 0 : i32
    %c0_i32_0 = arith.constant 0 : i32
    %c0_i32_1 = arith.constant 0 : i32
    return %c0_i32, %c0_i32_0 : i32, i32
  }
  func.func @transform_9(%arg0: i32) -> (i32, i32) {
    %c0_i32 = arith.constant 0 : i32
    %c0_i32_0 = arith.constant 0 : i32
    return %arg0, %c0_i32 : i32, i32
  }
}

</mosaic_0001>

<bundles_post_ra>
// kernel: tpu_custom_call.1
= control target key start
LH: loop header
LB: loop body
LE: loop exit
PB: predicated region body
PF: predicated region fallthrough
CT: control target
= control target key end

     0   :  { %14 = vsyncpa [#allocation3], 0  ;;  %s961_s0 = inlined_call_operand.vmem [shape: bf16[8,32], index: 0, kind: input, shape index: {}]   ;;  %s962_s1 = inlined_call_operand.vmem [shape: bf16[8,32], index: 1, kind: input, shape index: {}]   ;;  %s963_s2 = inlined_call_operand.hbm [shape: bf16[32,256], index: 2, kind: input, shape index: {}]   ;;  %s964_s3 = inlined_call_operand.vmem [shape: f32[64,4], index: 3, kind: input, shape index: {}]   ;;  %s965_s4 = inlined_call_operand.vmem [shape: f32[4,64], index: 4, kind: input, shape index: {}]   ;;  %s966_s5 = inlined_call_operand.vmem [shape: f32[1,64], index: 5, kind: input, shape index: {}]   ;;  %s967_s6 = inlined_call_operand.vmem [shape: f32[1,64], index: 6, kind: input, shape index: {}]   ;;  %s968_s7 = inlined_call_operand.vmem [shape: bf16[128,128], index: 7, kind: input, shape index: {}]   ;;  %s969_s8 = inlined_call_operand.vmem [shape: f32[1,128], index: 8, kind: input, shape index: {}]   ;;  %s970_s9 = inlined_call_operand.hbm [shape: f32[8,128], index: 9, kind: output, shape index: {}]  }
   0x1   :  { %15 = vsyncpa [#allocation4], 0  ;;  %s766_s30 = smov [#allocation2]   ;;  %s718_s13 = scalar_lea.hbm %s963_s2, 512 }
   0x2   :  { %s25_s10 = sshll.u32 %s766_s30, 4  ;;  %p719_p0 = scmp.ne.s32.totalorder %s963_s2, %s718_s13  ;;  %s26_s10 = int_to_ptr.vmem [resolvable:$true] %s25_s10 }
   0x3   :  { %p722_p1 = scmp.lt.u32.totalorder %s718_s13, %s963_s2 }
   0x5   :  { %p724_p2 = pnand %p722_p1, %p719_p0 }
   0x7   :  { %727 = shalt.err (!%p724_p2)
}
   0x8   :  { %s728_s18 = scalar_lea.vmem %s26_s10, 512  ;;  %p733_p4 = scmp.lt.s32.totalorder %s26_s10, %s26_s10 }
   0x9   :  { %p729_p3 = scmp.ne.s32.totalorder %s26_s10, %s728_s18  ;;  %p734_p5 = scmp.lt.s32.totalorder %s728_s18, %s728_s18 }
   0xb   :  { %p735_p6 = por %p734_p5, %p733_p4 }
   0xd   :  { %p736_p7 = pnand %p735_p6, %p729_p3 }
   0xf   :  { %739 = shalt.err (!%p736_p7)
}
  0x10   :  { %s767_s19 = smov 128   ;;  %s768_s20 = smov 8  }
  0x11   :  { %31 = dma.hbm_to_vmem [thread:$0]  %s963_s2, 512, %s26_s10, [#allocation3], %s767_s19, %s767_s19, %s768_s20  }
  0x12   :  { %762 = dma.done.wait [#allocation3], 512  }
  0x13   :  { %763 = vsyncadd [#allocation3], 4294966784  ;;  %v769_v0 = vmov 0   ;;  %v695_v1 = vld [vmem:[#allocation2 + $0x4] ss:$8 sps:$4 sm:$0xff]   ;;  %vm53_vm0 = vcmask 1043456  }
  0x14   :  { %116 = vmatprep.mubr.bf16.mxu1 %v769_v0  ;;  %687 = vset.pattern.permute.xlu1 %v769_v0  ;;  %v697_v2 = vld [vmem:[#allocation2] ss:$8 sps:$4 sm:$0xff]   ;;  %vm81_vm1 = vcmask 261120   ;;  %v698_v3 = vld [vmem:[#allocation2 + $0x14] ss:$8 sps:$4 sm:$0xff]   ;;  %s770_s19 = smov 64  }
  0x15   :  { %84 = vmatprep.subr.bf16.mxu1 %v695_v1  ;;  %v700_v4 = vld [vmem:[#allocation2 + $0x10] ss:$8 sps:$4 sm:$0xff]   ;;  %v48_v5 = vld [vmem:[%s961_s0] sm:$0xf]  ;;  %v138_v9 = vld [vmem:[%s964_s3 + $0x8] sm:$0xff]  ;;  %vm145_vm2 = vcmask 523264  }
  0x16   :  { %85 = vmatpush1.bf16.msra.mxu1 %v697_v2  ;;  %v701_v6 = vld [vmem:[%s962_s1] ss:$0 sps:$4 sm:$0xff]   ;;  %v139_v10 = vld [vmem:[%s964_s3 + $0x10] sm:$0xff]  ;;  %v140_v12 = vld [vmem:[%s964_s3 + $0x18] sm:$0xff]  ;;  %vm227_vm3 = vcmask 31744   ;;  %v771_v42 = vmov 2  }
  0x17   :  { %86 = vmatprep.subr.bf16.mxu1 %v698_v3  ;;  %v56_v7 = vsel %vm53_vm0, %v48_v5, %v701_v6  ;;  %v137_v8 = vld [vmem:[%s964_s3] sm:$0xff]  ;;  %v664_v13 = vpack.c.bf16 %v140_v12, %v139_v10  ;;  %v142_v15 = vld [vmem:[%s964_s3 + $0x28] sm:$0xff]  ;;  %v143_v17 = vld [vmem:[%s964_s3 + $0x30] sm:$0xff]  ;;  %691 = vset.pattern.permute.xlu0 %v771_v42  ;;  %v772_v43 = vmov 0.0   ;;  %v773_v50 = vmov 3   ;;  %s776_s16 = smov [#allocation5]  }
  0x18   :  { %v660_v11 = vpack.c.bf16 %v138_v9, %v137_v8  ;;  %v141_v14 = vld [vmem:[%s964_s3 + $0x20] sm:$0xff]  ;;  %v144_v18 = vld [vmem:[%s964_s3 + $0x38] sm:$0xff]  ;;  %640 = vmatprep.subr.bf16.mxu0 %v772_v43  ;;  %v774_v51 = vmov 1   ;;  %vm775_vm14 = vmmov 0   ;;  %s553_s17 = sshll.u32 %s776_s16, 4  ;;  %s554_s17 = int_to_ptr.vmem [resolvable:$true] %s553_s17 }
  0x19   :  { %v668_v16 = vpack.c.bf16 %v142_v15, %v141_v14  ;;  %v672_v19 = vpack.c.bf16 %v144_v18, %v143_v17  ;;  %v322_v52 = vld [vmem:[%s965_s4] sm:$0xf]  ;;  %v703_v14 = vld [vmem:[%s968_s7 + $0x8] sm:$0xff]   ;;  %v704_v15 = vld [vmem:[%s968_s7 + $0x10] sm:$0xff]   ;;  %656 = vmatprep.mubr.msk.bf16.mxu0 %vm775_vm14, %v772_v43  ;;  %p745_p9 = scmp.lt.s32.totalorder %s554_s17, %s554_s17 }
  0x1a   :  { %87 = vmatpush1.bf16.msra.mxu1 %v700_v4  ;;  %v706_v17 = vld [vmem:[%s968_s7 + $0x20] sm:$0xff]   ;;  %v707_v18 = vld [vmem:[%s968_s7 + $0x28] sm:$0xff]  }
  0x1b   :  { %661 = vmatprep.subr.bf16.mxu1 %v660_v11 }
  0x1d   :  { %567 = vmatmul.mubr.msk.bf16.vlgmr.msra.gmra.mrb[0].mxu1 %vm81_vm1, %v56_v7 }
  0x1e   :  { %663 = vmatpush3.bf16.msra.mxu1 %v660_v11 }
  0x1f   :  { %665 = vmatprep.subr.bf16.mxu1 %v664_v13 }
  0x22   :  { %667 = vmatpush3.bf16.msra.mxu1 %v664_v13  ;;  %v702_v13 = vld [vmem:[%s968_s7] sm:$0xff]  }
  0x23   :  { %669 = vmatprep.subr.bf16.mxu1 %v668_v16  ;;  %641 = vmatpush3.bf16.msra.mxu0 %v702_v13 }
  0x24   :  { %642 = vmatprep.subr.bf16.mxu0 %v772_v43 }
  0x26   :  { %671 = vmatpush3.bf16.msra.mxu1 %v668_v16  ;;  %v705_v16 = vld [vmem:[%s968_s7 + $0x18] sm:$0xff]  }
  0x27   :  { %673 = vmatprep.subr.bf16.mxu1 %v672_v19  ;;  %643 = vmatpush3.bf16.msra.mxu0 %v703_v14 }
  0x28   :  { %644 = vmatprep.subr.bf16.mxu0 %v772_v43 }
  0x2a   :  { %675 = vmatpush3.bf16.msra.mxu1 %v672_v19  ;;  %v708_v19 = vld [vmem:[%s968_s7 + $0x30] sm:$0xff]  }
  0x2b   :  { %635 = vmatprep.subr.msk.mxu1 %vm53_vm0, %v322_v52  ;;  %645 = vmatpush3.bf16.msra.mxu0 %v704_v15 }
  0x2c   :  { %646 = vmatprep.subr.bf16.mxu0 %v772_v43 }
  0x2f   :  { %647 = vmatpush3.bf16.msra.mxu0 %v705_v16 }
  0x30   :  { %648 = vmatprep.subr.bf16.mxu0 %v772_v43 }
  0x33   :  { %649 = vmatpush3.bf16.msra.mxu0 %v706_v17 }
  0x34   :  { %650 = vmatprep.subr.bf16.mxu0 %v772_v43 }
  0x37   :  { %651 = vmatpush3.bf16.msra.mxu0 %v707_v18 }
  0x38   :  { %652 = vmatprep.subr.bf16.mxu0 %v772_v43 }
  0x3b   :  { %653 = vmatpush3.bf16.msra.mxu0 %v708_v19 }
  0x3c   :  { %654 = vmatprep.subr.bf16.mxu0 %v772_v43 }
  0xf0   :  { %v118_v20 = vpop.f32.mrb[0].mxu1 }
  0xf1   :  { %v872_v21 = vpop.f32.mrb[1].mxu1 }
  0xf2   :  { %v122_v22 = vpop.f32.mrb[2].mxu1 }
  0xf3   :  { %128 = vrot.lane.b32.xlu0 %v122_v22, %s770_s19  ;;  %v875_v23 = vpop.f32.mrb[3].mxu1 }
  0xf7   :  { %133 = vrot.lane.b32.xlu0 %v118_v20, %s770_s19 }
 0x165   :  { %v129_v24 = vpop.permute.xlu0 %128 }
 0x166   :  { %v131_v25 = vmul.f32 %v129_v24, %v118_v20  ;;  %v709_v20 = vld [vmem:[%s968_s7 + $0x38] sm:$0xff]  }
 0x167   :  { %655 = vmatpush3.bf16.msra.mxu0 %v709_v20 }
 0x168   :  { %632 = vmatprep.mubr.msk.f32.mxu1 %vm145_vm2, %v131_v25 }
 0x169   :  { %v134_v26 = vpop.permute.xlu0 %133 }
 0x16a   :  { %v136_v27 = vmul.f32 %v134_v26, %v122_v22  ;;  %v584_v26 = vld [vmem:[%s967_s6] ss:$0 sm:$0xff] }
 0x16c   :  { %633 = vmatmul.mubr.msk.f32.vlgmr.msra.gmra.mrb[4].mxu1 %vm145_vm2, %v136_v27  ;;  %v583_v27 = vld [vmem:[%s966_s5] ss:$0 sm:$0xff]  ;;  %s740_s5 = scalar_lea.vmem %s554_s17, 128 }
 0x16d   :  { %636 = vmatpush3.msk.msra.mxu1 %vm53_vm0, %v322_v52  ;;  %p741_p8 = scmp.ne.s32.totalorder %s554_s17, %s740_s5  ;;  %p746_p10 = scmp.lt.s32.totalorder %s740_s5, %s740_s5 }
 0x16f   :  { %p747_p11 = por %p746_p10, %p745_p9 }
 0x171   :  { %p748_p12 = pnand %p747_p11, %p741_p8 }
 0x23f   :  { %v634_v28 = vpop.f32.mrb[4].mxu1 }
 0x240   :  { %v218_v29 = vpop.f32.mrb[5].mxu1  ;;  %v231_v31 = vsel %vm227_vm3, %v634_v28, -inf }
 0x241   :  { %v228_v30 = vsel %vm227_vm3, %v218_v29, -inf }
 0x242   :  { %229 = vmax.xlane.f32.xlu1 %v228_v30 }
 0x246   :  { %232 = vmax.xlane.f32.xlu1 %v231_v31 }
 0x2cf   :  { %v230_v32 = vpop.xlane.xlu1 %229 }
 0x2d0   :  { %v234_v33 = vsub.f32 %v218_v29, %v230_v32 }
 0x2d2   :  { %v236_v34 = vmul.f32 1.442695, %v234_v33 }
 0x2d3   :  { %v233_v35 = vpop.xlane.xlu1 %232 }
 0x2d4   :  { %710 = vpow2.f32 %v236_v34  ;;  %v235_v36 = vsub.f32 %v634_v28, %v233_v35 }
 0x2d6   :  { %v238_v37 = vmul.f32 1.442695, %v235_v36  ;;  %v585_v36 = vld [vmem:[%s969_s8] ss:$0 sm:$0xff] }
 0x2d8   :  { %712 = vpow2.f32 %v238_v37 }
 0x2de   :  { %v711_v38 = vpop.eup %710 }
 0x2df   :  { %v240_v39 = vsel %vm227_vm3, %v711_v38, 0.0 }
 0x2e0   :  { %241 = vadd.xlane.f32.xlu0 %v240_v39 }
 0x2e2   :  { %v713_v40 = vpop.eup %712 }
 0x2e3   :  { %v243_v41 = vsel %vm227_vm3, %v713_v40, 0.0 }
 0x2e4   :  { %244 = vadd.xlane.f32.xlu1 %v243_v41 }
 0x36d   :  { %v242_v44 = vpop.xlane.xlu0 %241 }
 0x36e   :  { %714 = vrcp.f32 %v242_v44 }
 0x371   :  { %v245_v45 = vpop.xlane.xlu1 %244 }
 0x372   :  { %716 = vrcp.f32 %v245_v45 }
 0x378   :  { %v715_v46 = vpop.eup %714 }
 0x379   :  { %v248_v47 = vmul.f32 %v715_v46, %v711_v38 }
 0x37b   :  { %285 = vperm.xlu0 %691, %v248_v47  }
 0x37c   :  { %v717_v48 = vpop.eup %716 }
 0x37d   :  { %v249_v49 = vmul.f32 %v717_v48, %v713_v40 }
 0x37f   :  { %257 = vperm.xlu1 %687, %v249_v49   ;;  %694 = vset.pattern.permute.xlu0 %v773_v50 }
 0x383   :  { %688 = vset.pattern.permute.xlu1 %v774_v51 }
 0x384   :  { %273 = vperm.xlu1 %688, %v249_v49  }
 0x388   :  { %689 = vset.pattern.permute.xlu1 %v769_v0 }
 0x389   :  { %252 = vperm.xlu1 %689, %v248_v47  }
 0x38d   :  { %690 = vset.pattern.permute.xlu1 %v774_v51 }
 0x38e   :  { %269 = vperm.xlu1 %690, %v248_v47  }
 0x392   :  { %692 = vset.pattern.permute.xlu1 %v771_v42 }
 0x393   :  { %289 = vperm.xlu1 %692, %v249_v49  }
 0x397   :  { %693 = vset.pattern.permute.xlu1 %v773_v50 }
 0x398   :  { %301 = vperm.xlu1 %693, %v248_v47  }
 0x39c   :  { %305 = vperm.xlu1 %693, %v249_v49  }
 0x3fa   :  { %v286_v57 = vpop.permute.xlu0 %285 }
 0x3fb   :  { %vm292_vm6 = vcmp.gt.f32.partialorder %v286_v57, %v248_v47 }
 0x3fc   :  { %v574_v62 = vsel %vm292_vm6, 1.0, %v772_v43 }
 0x3fe   :  { %v258_v53 = vpop.permute.xlu1 %257 }
 0x3ff   :  { %vm261_vm8 = vcmp.gt.f32.partialorder %v258_v53, %v249_v49 }
 0x400   :  { %v571_v2 = vsel %vm261_vm8, 1.0, %v772_v43 }
 0x403   :  { %v274_v54 = vpop.permute.xlu1 %273 }
 0x404   :  { %vm277_vm7 = vcmp.gt.f32.partialorder %v274_v54, %v249_v49 }
 0x405   :  { %v573_v63 = vsel %vm277_vm7, 1.0, %v772_v43 }
 0x406   :  { %v283_v5 = vadd.f32 %v573_v63, %v571_v2 }
 0x408   :  { %v253_v55 = vpop.permute.xlu1 %252 }
 0x409   :  { %vm260_vm5 = vcmp.gt.f32.partialorder %v253_v55, %v248_v47 }
 0x40a   :  { %v570_v60 = vsel %vm260_vm5, 1.0, %v772_v43 }
 0x40d   :  { %v270_v56 = vpop.permute.xlu1 %269 }
 0x40e   :  { %vm276_vm4 = vcmp.gt.f32.partialorder %v270_v56, %v248_v47 }
 0x40f   :  { %v572_v58 = vsel %vm276_vm4, 1.0, %v772_v43 }
 0x410   :  { %v282_v61 = vadd.f32 %v572_v58, %v570_v60 }
 0x412   :  { %v290_v59 = vpop.permute.xlu1 %289  ;;  %v298_v1 = vadd.f32 %v574_v62, %v282_v61 }
 0x413   :  { %vm293_vm9 = vcmp.gt.f32.partialorder %v290_v59, %v249_v49 }
 0x414   :  { %v575_v3 = vsel %vm293_vm9, 1.0, %v772_v43 }
 0x415   :  { %v299_v8 = vadd.f32 %v575_v3, %v283_v5 }
 0x417   :  { %v302_v0 = vpop.permute.xlu1 %301 }
 0x418   :  { %vm308_vm10 = vcmp.gt.f32.partialorder %v302_v0, %v248_v47 }
 0x419   :  { %v576_v4 = vsel %vm308_vm10, 1.0, %v772_v43 }
 0x41a   :  { %v314_v6 = vadd.f32 %v576_v4, %v298_v1 }
 0x41b   :  { %v306_v7 = vpop.permute.xlu1 %305 }
 0x41c   :  { %vm316_vm11 = vcmp.lt.f32.partialorder %v314_v6, 2.0  ;;  %vm309_vm12 = vcmp.gt.f32.partialorder %v306_v7, %v249_v49 }
 0x41d   :  { %v577_v9 = vsel %vm309_vm12, 1.0, %v772_v43  ;;  %v578_v10 = vsel %vm316_vm11, 1.0, %v772_v43 }
 0x41e   :  { %v315_v11 = vadd.f32 %v577_v9, %v299_v8  ;;  %637 = vmatprep.mubr.msk.f32.mxu1 %vm227_vm3, %v578_v10 }
 0x420   :  { %vm317_vm13 = vcmp.lt.f32.partialorder %v315_v11, 2.0 }
 0x421   :  { %v579_v12 = vsel %vm317_vm13, 1.0, %v772_v43 }
 0x422   :  { %638 = vmatmul.mubr.msk.f32.vlgmr.msra.gmra.mrb[6].mxu1 %vm227_vm3, %v579_v12 }
 0x4f5   :  { %v639_v22 = vpop.f32.mrb[6].mxu1 }
 0x4f6   :  { %418 = vrot.lane.b32.xlu1 %v639_v22, %s770_s19  ;;  %v398_v24 = vpop.f32.mrb[7].mxu1 }
 0x4f7   :  { %v407_v25 = vmul.f32 %v398_v24, %v872_v21 }
 0x4f9   :  { %v415_v29 = vadd.f32 %v583_v27, %v407_v25 }
 0x4fa   :  { %428 = vrot.lane.b32.xlu1 %v584_v26, %s770_s19 }
 0x4fb   :  { %v416_v33 = vmax.f32 %v415_v29, 0.0 }
 0x568   :  { %v419_v28 = vpop.permute.xlu1 %418 }
 0x569   :  { %v421_v30 = vmul.f32 %v419_v28, %v875_v23 }
 0x56c   :  { %v429_v31 = vpop.permute.xlu1 %428 }
 0x56d   :  { %v431_v32 = vadd.f32 %v429_v31, %v421_v30 }
 0x56f   :  { %v432_v34 = vmax.f32 %v431_v32, 0.0 }
 0x571   :  { %v433_v21 = vsel %vm145_vm2, %v416_v33, %v432_v34 }
 0x572   :  { %v434_v35 = vpack.c.bf16 %v433_v21, %v433_v21 }
 0x574   :  { %657 = vmatmul.mubr.bf16.vlgmr.msra.gmra.mrb[0].mxu0 %v434_v35 }
 0x647   :  { %v540_v37 = vpop.f32.mrb[0].mxu0 }
 0x648   :  { %v541_v38 = vadd.f32 %v585_v36, %v540_v37  ;;  %v658_v39 = vpop.f32.mrb[1].mxu0 }
 0x649   :  { %v543_v40 = vpop.f32.mrb[2].mxu0 }
 0x64a   :  { %546 = vst [vmem:[#allocation5] sm:$0xff] %v541_v38  ;;  %v659_v23 = vpop.f32.mrb[3].mxu0 }
 0x64b   :  { %751 = shalt.err (!%p748_p12)
}
 0x64c   :  { %s752_s8 = scalar_lea.hbm %s970_s9, 128 }
 0x64d   :  { %p753_p13 = scmp.ne.s32.totalorder %s970_s9, %s752_s8  ;;  %p756_p0 = scmp.lt.u32.totalorder %s752_s8, %s970_s9 }
 0x64f   :  { %p758_p1 = pnand %p756_p0, %p753_p13 }
 0x651   :  { %761 = shalt.err (!%p758_p1)
}
 0x652   :  { %556 = dma.vmem_to_hbm [thread:$0]  %s554_s17, 128, %s970_s9, [#allocation4]  }
 0x653   :  { %764 = dma.done.wait [#allocation4], 128  }
 0x654   :  { %765 = vsyncadd [#allocation4], 4294967168 }
 0x655   :  { %560 = vsyncpa [#allocation3], 1 }
 0x656   :  { %561 = vsyncpa [#allocation4], 1 }

</bundles_post_ra>
